<compile_context>
chip_gen: v7x
topology: tpu7x:2x2x1
jax: 0.10.0
libtpu: 0.0.40
codegen_flags: <defaults>
</compile_context>

<pallas_src>
import functools

import numpy as np
import jax
import jax.numpy as jnp
from jax import lax
from jax.experimental import pallas as pl
from jax.experimental.pallas import tpu as pltpu

BUFFER_PCT = 0.2  # the reference forward overrides the random draw with 0.2

# Below this many bytes per cropped row, the narrow-window DMA degenerates into
# many short bursts; prefer full-row DMA + static slice copy instead.
_NARROW_DMA_MIN_ROW_BYTES = 512


def _ldmk_shift(l2_ref, l3_ref, l2_out_ref, l3_out_ref, nx0, ny0):
    """Subtract the (static) new bbox origin from the landmark x/y columns (VPU)."""
    l2 = l2_ref[...]
    col2 = lax.broadcasted_iota(jnp.int32, l2.shape, 1)
    l2_out_ref[...] = l2 - jnp.where(col2 == 0, nx0, ny0).astype(l2.dtype)

    l3 = l3_ref[...]
    col3 = lax.broadcasted_iota(jnp.int32, l3.shape, 1)
    off3 = jnp.where(col3 == 0, nx0, jnp.where(col3 == 1, ny0, 0))
    l3_out_ref[...] = l3 - off3.astype(l3.dtype)


def _crop_kernel_narrow(img_ref, l2_ref, l3_ref,
                        crop_ref, l2_out_ref, l3_out_ref,
                        sem_ref, *, nx0, ny0, H_out, W_out):
    # Pure statically-strided windowed DMA: HBM (C, H_out, W_out) window -> crop.
    cp = pltpu.make_async_copy(
        img_ref.at[:, pl.ds(ny0, H_out), pl.ds(nx0, W_out)],
        crop_ref,
        sem_ref.at[0])
    cp.start()
    # Landmark VPU work overlapped with the DMA.
    _ldmk_shift(l2_ref, l3_ref, l2_out_ref, l3_out_ref, nx0, ny0)
    cp.wait()


def _crop_kernel_rowslab(img_ref, l2_ref, l3_ref,
                         crop_ref, l2_out_ref, l3_out_ref,
                         slab_ref, sem_ref, *, nx0, ny0, H_out, W_out):
    # Full-row DMA of only the needed rows (long contiguous bursts per channel).
    cp = pltpu.make_async_copy(
        img_ref.at[:, pl.ds(ny0, H_out), :],
        slab_ref,
        sem_ref.at[0])
    cp.start()
    _ldmk_shift(l2_ref, l3_ref, l2_out_ref, l3_out_ref, nx0, ny0)
    cp.wait()
    # Column crop = static slice copy (no dynamic roll, no masked full-width store).
    crop_ref[...] = slab_ref[:, :, pl.ds(nx0, W_out)]


def bbox_aug_crop(bbox_host, img, ldmks2d, ldmks3d):
    """bbox_host: concrete int array [x0, y0, w, h].  All crop geometry is
    resolved on the host (needed anyway for the static output shape)."""
    bb = np.asarray(bbox_host, dtype=np.int64)
    C, H, W = img.shape
    x0, y0, bw, bh = int(bb[0]), int(bb[1]), int(bb[2]), int(bb[3])

    # Exact mirror of the reference formula (including its (H - w, W - h) pairing).
    min_low = min(x0 // 2, y0 // 2)
    min_high = min((H - bw) // 2, (W - bh) // 2)
    buf = int(BUFFER_PCT * min(min_low, min_high))

    nx0, ny0 = x0 - buf, y0 - buf
    W_out, H_out = bw + 2 * buf, bh + 2 * buf
    new_bbox = np.array([nx0, ny0, W_out, H_out], dtype=np.int32)  # intentional int32

    # The reference does no clamping; make the contract explicit instead of
    # silently wrapping / clipping.
    assert 0 <= nx0 and 0 <= ny0, "bbox with buffer runs off the top/left edge"
    assert nx0 + W_out <= W and ny0 + H_out <= H, \
        "bbox with buffer runs off the bottom/right edge"
    assert H_out > 0 and W_out > 0, "degenerate crop"

    itemsize = int(jnp.dtype(img.dtype).itemsize)
    use_narrow = (W_out * itemsize >= _NARROW_DMA_MIN_ROW_BYTES) or (W_out == W)

    crop_bytes = C * H_out * W_out * itemsize
    if use_narrow:
        kernel = functools.partial(_crop_kernel_narrow,
                                   nx0=nx0, ny0=ny0, H_out=H_out, W_out=W_out)
        scratch_shapes = [pltpu.SemaphoreType.DMA((1,))]
        vmem_needed = crop_bytes
    else:
        kernel = functools.partial(_crop_kernel_rowslab,
                                   nx0=nx0, ny0=ny0, H_out=H_out, W_out=W_out)
        scratch_shapes = [pltpu.VMEM((C, H_out, W), img.dtype),
                          pltpu.SemaphoreType.DMA((1,))]
        vmem_needed = crop_bytes + C * H_out * W * itemsize

    # Only raise the scoped VMEM limit when the computed footprint needs it
    # (keeps defaults for small crops; avoids v7x 32 MiB scoped-default OOM for
    # large ones).
    compiler_params = None
    if 2 * vmem_needed > (32 << 20):
        compiler_params = pltpu.CompilerParams(
            vmem_limit_bytes=min(2 * vmem_needed + (4 << 20), 100 << 20))

    out_shape = (
        jax.ShapeDtypeStruct((C, H_out, W_out), img.dtype),      # cropped img
        jax.ShapeDtypeStruct(ldmks2d.shape, ldmks2d.dtype),      # shifted ldmks2D
        jax.ShapeDtypeStruct(ldmks3d.shape, ldmks3d.dtype),      # shifted ldmks3D
    )

    img_crop, l2_out, l3_out = pl.pallas_call(
        kernel,
        out_shape=out_shape,
        in_specs=[
            pl.BlockSpec(memory_space=pl.ANY),                   # img stays in HBM
            pl.BlockSpec(memory_space=pltpu.MemorySpace.VMEM),   # ldmks2D
            pl.BlockSpec(memory_space=pltpu.MemorySpace.VMEM),   # ldmks3D
        ],
        out_specs=(
            pl.BlockSpec(memory_space=pltpu.MemorySpace.VMEM),
            pl.BlockSpec(memory_space=pltpu.MemorySpace.VMEM),
            pl.BlockSpec(memory_space=pltpu.MemorySpace.VMEM),
        ),
        scratch_shapes=scratch_shapes,
        compiler_params=compiler_params,
    )(img, ldmks2d, ldmks3d)

    return {"bbox": jnp.asarray(new_bbox), "img": img_crop,
            "ldmks2D": l2_out, "ldmks3D": l3_out}


def _numpy_reference(bbox, img, l2, l3):
    bbox = np.asarray(bbox, dtype=np.int64)
    min_low = np.min(bbox[:2] // 2)
    min_high = np.min((np.array(img.shape[1:], dtype=np.int64) - bbox[2:]) // 2)
    buf = int(BUFFER_PCT * min(int(min_low), int(min_high)))   # reference formula
    nb = bbox + np.array([-buf, -buf, 2 * buf, 2 * buf], dtype=np.int64)
    crop = img[:, nb[1]:nb[1] + nb[3], nb[0]:nb[0] + nb[2]]
    l2o = l2 - nb[:2].astype(l2.dtype)
    l3o = l3.copy()
    l3o[:, :2] -= nb[:2].astype(l3.dtype)
    return nb, crop, l2o, l3o


def _check(bbox_host, img, l2, l3):
    out = bbox_aug_crop(bbox_host, img, l2, l3)
    jax.block_until_ready(out)
    nb_ref, crop_ref_np, l2_ref_np, l3_ref_np = _numpy_reference(
        bbox_host, np.asarray(img), np.asarray(l2), np.asarray(l3))
    np.testing.assert_array_equal(np.asarray(out["bbox"]), nb_ref.astype(np.int32))
    np.testing.assert_array_equal(np.asarray(out["img"]), crop_ref_np)
    np.testing.assert_allclose(np.asarray(out["ldmks2D"]), l2_ref_np, rtol=1e-6, atol=1e-6)
    np.testing.assert_allclose(np.asarray(out["ldmks3D"]), l3_ref_np, rtol=1e-6, atol=1e-6)


if __name__ == "__main__":
    key = jax.random.PRNGKey(0)
    k1, k2, k3, k4, k5, k6 = jax.random.split(key, 6)
    N = 8

    # --- Config 1: tiny W_out -> row-slab path (full-row DMA + static slice) ---
    C1, H1, W1 = 3, 96, 128
    bbox1 = np.array([40, 48, 40, 24], dtype=np.int64)    # -> crop (3, 32, 48)
    img1 = jax.random.normal(k1, (C1, H1, W1), dtype=jnp.float32)
    l2_1 = jax.random.uniform(k2, (N, 2), dtype=jnp.float32, minval=30.0, maxval=80.0)
    l3_1 = jax.random.uniform(k3, (N, 3), dtype=jnp.float32, minval=30.0, maxval=80.0)
    _check(bbox1, img1, l2_1, l3_1)

    # --- Config 2: wide W_out -> narrow-window direct DMA path ------------------
    C2, H2, W2 = 3, 160, 256
    bbox2 = np.array([48, 40, 144, 96], dtype=np.int64)   # -> crop (3, 98, 146)
    img2 = jax.random.normal(k4, (C2, H2, W2), dtype=jnp.float32)
    l2_2 = jax.random.uniform(k5, (N, 2), dtype=jnp.float32, minval=40.0, maxval=120.0)
    l3_2 = jax.random.uniform(k6, (N, 3), dtype=jnp.float32, minval=40.0, maxval=120.0)
    _check(bbox2, img2, l2_2, l3_2)

    print("KERNEL_OK")
</pallas_src>

<mosaic_0001>
module attributes {stable_mosaic.version = 11 : i64} {
  func.func @_crop_kernel_rowslab(%arg0: memref<3x96x128xf32, #tpu.memory_space<any>>, %arg1: memref<8x2xf32, #tpu.memory_space<vmem>>, %arg2: memref<8x3xf32, #tpu.memory_space<vmem>>, %arg3: memref<3x32x48xf32, #tpu.memory_space<vmem>>, %arg4: memref<8x2xf32, #tpu.memory_space<vmem>>, %arg5: memref<8x3xf32, #tpu.memory_space<vmem>>, %arg6: memref<3x32x128xf32, #tpu.memory_space<vmem>>, %arg7: memref<1x!tpu.dma_semaphore, #tpu.memory_space<semaphore_mem>>) attributes {dimension_semantics = [], scalar_prefetch = 0 : i64, scratch_operands = 2 : i64, tpu.core_type = #tpu.core_type<tc>} {
    %c0_i32 = arith.constant 0 : i32
    %c0_i32_0 = arith.constant 0 : i32
    %c44_i32 = arith.constant 44 : i32
    %c0_i32_1 = arith.constant 0 : i32
    %0 = tpu.memref_slice %arg0[%c0_i32_0, %c44_i32, %c0_i32_1] : memref<3x96x128xf32, #tpu.memory_space<any>> -> memref<3x32x128xf32, #tpu.memory_space<any>>
    %1 = tpu.memref_slice %arg7[%c0_i32] : memref<1x!tpu.dma_semaphore, #tpu.memory_space<semaphore_mem>> -> memref<1x!tpu.dma_semaphore, #tpu.memory_space<semaphore_mem>>
    %2 = tpu.memref_squeeze %1 : memref<1x!tpu.dma_semaphore, #tpu.memory_space<semaphore_mem>> -> memref<!tpu.dma_semaphore, #tpu.memory_space<semaphore_mem>>
    tpu.enqueue_dma source(%0 : memref<3x32x128xf32, #tpu.memory_space<any>>) target(%arg6 : memref<3x32x128xf32, #tpu.memory_space<vmem>>) target_semaphore(%2 : memref<!tpu.dma_semaphore, #tpu.memory_space<semaphore_mem>>)
    %c0 = arith.constant 0 : index
    %c0_2 = arith.constant 0 : index
    %3 = vector.load %arg1[%c0, %c0_2] : memref<8x2xf32, #tpu.memory_space<vmem>>, vector<8x2xf32>
    %4 = tpu.iota {dimensions = array<i32: 1>} : vector<8x2xi32>
    %c0_i32_3 = arith.constant 0 : i32
    %5 = vector.broadcast %c0_i32_3 : i32 to vector<8x2xi32>
    %6 = arith.cmpi eq, %4, %5 : vector<8x2xi32>
    %c36_i32 = arith.constant 36 : i32
    %c44_i32_4 = arith.constant 44 : i32
    %7 = vector.broadcast %c36_i32 : i32 to vector<8x2xi32>
    %8 = vector.broadcast %c44_i32_4 : i32 to vector<8x2xi32>
    %9 = arith.select %6, %7, %8 : vector<8x2xi1>, vector<8x2xi32>
    %10 = arith.sitofp %9 : vector<8x2xi32> to vector<8x2xf32>
    %11 = arith.subf %3, %10 : vector<8x2xf32>
    %c0_5 = arith.constant 0 : index
    %c0_6 = arith.constant 0 : index
    %12 = vector.load %arg4[%c0_5, %c0_6] : memref<8x2xf32, #tpu.memory_space<vmem>>, vector<8x2xf32>
    tpu.vector_store %arg4[%c0_5, %c0_6], %11 {strides = array<i32>} : memref<8x2xf32, #tpu.memory_space<vmem>>, vector<8x2xf32>,
    %c0_7 = arith.constant 0 : index
    %c0_8 = arith.constant 0 : index
    %13 = vector.load %arg2[%c0_7, %c0_8] : memref<8x3xf32, #tpu.memory_space<vmem>>, vector<8x3xf32>
    %14 = tpu.iota {dimensions = array<i32: 1>} : vector<8x3xi32>
    %c0_i32_9 = arith.constant 0 : i32
    %15 = vector.broadcast %c0_i32_9 : i32 to vector<8x3xi32>
    %16 = arith.cmpi eq, %14, %15 : vector<8x3xi32>
    %c1_i32 = arith.constant 1 : i32
    %17 = vector.broadcast %c1_i32 : i32 to vector<8x3xi32>
    %18 = arith.cmpi eq, %14, %17 : vector<8x3xi32>
    %c44_i32_10 = arith.constant 44 : i32
    %c0_i32_11 = arith.constant 0 : i32
    %19 = vector.broadcast %c44_i32_10 : i32 to vector<8x3xi32>
    %20 = vector.broadcast %c0_i32_11 : i32 to vector<8x3xi32>
    %21 = arith.select %18, %19, %20 : vector<8x3xi1>, vector<8x3xi32>
    %c36_i32_12 = arith.constant 36 : i32
    %22 = vector.broadcast %c36_i32_12 : i32 to vector<8x3xi32>
    %23 = arith.select %16, %22, %21 : vector<8x3xi1>, vector<8x3xi32>
    %24 = arith.sitofp %23 : vector<8x3xi32> to vector<8x3xf32>
    %25 = arith.subf %13, %24 : vector<8x3xf32>
    %c0_13 = arith.constant 0 : index
    %c0_14 = arith.constant 0 : index
    %26 = vector.load %arg5[%c0_13, %c0_14] : memref<8x3xf32, #tpu.memory_space<vmem>>, vector<8x3xf32>
    tpu.vector_store %arg5[%c0_13, %c0_14], %25 {strides = array<i32>} : memref<8x3xf32, #tpu.memory_space<vmem>>, vector<8x3xf32>,
    %c0_i32_15 = arith.constant 0 : i32
    %c0_i32_16 = arith.constant 0 : i32
    %c44_i32_17 = arith.constant 44 : i32
    %c0_i32_18 = arith.constant 0 : i32
    %27 = tpu.memref_slice %arg0[%c0_i32_16, %c44_i32_17, %c0_i32_18] : memref<3x96x128xf32, #tpu.memory_space<any>> -> memref<3x32x128xf32, #tpu.memory_space<any>>
    %28 = tpu.memref_slice %arg7[%c0_i32_15] : memref<1x!tpu.dma_semaphore, #tpu.memory_space<semaphore_mem>> -> memref<1x!tpu.dma_semaphore, #tpu.memory_space<semaphore_mem>>
    %29 = tpu.memref_squeeze %28 : memref<1x!tpu.dma_semaphore, #tpu.memory_space<semaphore_mem>> -> memref<!tpu.dma_semaphore, #tpu.memory_space<semaphore_mem>>
    tpu.wait_dma2 semaphore(%29 : memref<!tpu.dma_semaphore, #tpu.memory_space<semaphore_mem>>) src(%27 : memref<3x32x128xf32, #tpu.memory_space<any>>) dst(%arg6 : memref<3x32x128xf32, #tpu.memory_space<vmem>>)
    %c0_19 = arith.constant 0 : index
    %c0_20 = arith.constant 0 : index
    %c36 = arith.constant 36 : index
    %30 = vector.load %arg6[%c0_19, %c0_20, %c36] : memref<3x32x128xf32, #tpu.memory_space<vmem>>, vector<3x32x48xf32>
    %c0_21 = arith.constant 0 : index
    %c0_22 = arith.constant 0 : index
    %c0_23 = arith.constant 0 : index
    %31 = vector.load %arg3[%c0_21, %c0_22, %c0_23] : memref<3x32x48xf32, #tpu.memory_space<vmem>>, vector<3x32x48xf32>
    tpu.vector_store %arg3[%c0_21, %c0_22, %c0_23], %30 {strides = array<i32>} : memref<3x32x48xf32, #tpu.memory_space<vmem>>, vector<3x32x48xf32>,
    return
  }
}

</mosaic_0001>

<bundles_post_ra>
// kernel: tpu_custom_call.1
= control target key start
LH: loop header
LB: loop body
LE: loop exit
PB: predicated region body
PF: predicated region fallthrough
CT: control target
= control target key end

     0   :  { %11 = vsyncpa [#allocation5], 0  ;;  %v23_v0 = vlaneseq  ;;  %s209_s21 = smov [#allocation2]   ;;  %s303_s0 = inlined_call_operand.hbm [shape: f32[3,96,128], index: 0, kind: input, shape index: {}]   ;;  %s304_s1 = inlined_call_operand.vmem [shape: f32[8,2], index: 1, kind: input, shape index: {}]   ;;  %s305_s2 = inlined_call_operand.vmem [shape: f32[8,3], index: 2, kind: input, shape index: {}]   ;;  %s306_s3 = inlined_call_operand.hbm [shape: f32[3,32,48], index: 3, kind: output, shape index: {0}]   ;;  %s307_s4 = inlined_call_operand.vmem [shape: f32[8,2], index: 4, kind: output, shape index: {1}]   ;;  %s308_s5 = inlined_call_operand.vmem [shape: f32[8,3], index: 5, kind: output, shape index: {2}]  }
   0x1   :  { %s252_s20 = scalar_lea.hbm %s303_s0, 704  ;;  %s18_s22 = sshll.u32 %s209_s21, 4  ;;  %v22_v2 = vld [vmem:[%s304_s1] sm:$0xff]  ;;  %s19_s22 = int_to_ptr.vmem [resolvable:$true] %s18_s22 }
   0x2   :  { %v24_v1 = vand.u32 127, %v23_v0  ;;  %s182_s27 = scalar_lea.hbm %s303_s0, 2240  ;;  %s160_s30 = scalar_lea.hbm %s303_s0, 4608 }
   0x3   :  { %p159_p0 = scmp.ne.s32.totalorder %s252_s20, %s182_s27  ;;  %p161_p1 = scmp.lt.u32.totalorder %s252_s20, %s303_s0 }
   0x4   :  { %p162_p2 = scmp.lt.u32.totalorder %s160_s30, %s182_s27  ;;  %p164_p4 = scmp.lt.u32.totalorder %s182_s27, %s252_s20 }
   0x6   :  { %p163_p3 = por %p162_p2, %p161_p1 }
   0x8   :  { %p165_p5 = por %p164_p4, %p163_p3 }
   0xa   :  { %p166_p6 = pnand %p165_p5, %p159_p0 }
   0xc   :  { %169 = shalt.err (!%p166_p6)  }
   0xd   :  { %s170_s1 = scalar_lea.vmem %s19_s22, 1536  ;;  %p175_p8 = scmp.lt.s32.totalorder %s19_s22, %s19_s22 }
   0xe   :  { %p171_p7 = scmp.ne.s32.totalorder %s19_s22, %s170_s1  ;;  %p176_p9 = scmp.lt.s32.totalorder %s170_s1, %s170_s1 }
  0x10   :  { %p177_p10 = por %p176_p9, %p175_p8 }
  0x12   :  { %p178_p11 = pnand %p177_p10, %p171_p7 }
  0x14   :  { %181 = shalt.err (!%p178_p11)  }
  0x15   :  { %s210_s8 = smov 1536   ;;  %s211_s9 = smov 512   ;;  %vm25_vm0 = vcmp.eq.s32.totalorder %v24_v1, 0  ;;  %vm32_vm1 = vcmp.eq.s32.totalorder %v24_v1, 1  ;;  %v213_v3 = vmov 44.0   ;;  %vm29_vm2 = vcmask 15360  }
  0x16   :  { %s212_s10 = smov 32   ;;  %v146_v4 = vsel %vm25_vm0, 36.0, %v213_v3  ;;  %v214_v5 = vmov 0   ;;  %v31_v8 = vld [vmem:[%s305_s2] sm:$0xff]  ;;  %vm37_vm3 = vcmask 23552  }
  0x17   :  { %21 = dma.hbm_to_vmem [thread:$0]  %s252_s20, 1536, %s19_s22, [#allocation3], %s210_s8, %s211_s9, %s212_s10  ;;  %v33_v6 = vsel %vm32_vm1, 44, %v214_v5  ;;  %v28_v7 = vsub.f32 %v22_v2, %v146_v4 }
  0x18   :  { %v34_v9 = vsel %vm25_vm0, 36, %v33_v6 }
  0x19   :  { %v35_v10 = vcvt.s32.f32 %v34_v9  ;;  %30 = vst.msk [vmem:[%s307_s4] sm:$0xff] %vm29_vm2, %v28_v7 }
  0x1b   :  { %v36_v11 = vsub.f32 %v31_v8, %v35_v10 }
  0x1d   :  { %38 = vst.msk [vmem:[%s308_s5] sm:$0xff] %vm37_vm3, %v36_v11 }
  0x1e   :  { %205 = dma.done.wait [#allocation3], 1536 }
  0x1f   :  { %206 = vsyncadd [#allocation3], 4294965760  ;;  %v45_v12 = vld [vmem:[#allocation2 + $0x10] sm:$0xff]  ;;  %v43_v13 = vld [vmem:[#allocation2] sm:$0xff]  ;;  %s215_s16 = smov 92   ;;  %vm103_vm4 = vcmask 392192  }
  0x20   :  { %71 = vrot.lane.b32.xlu1 %v45_v12, %s215_s16  ;;  %67 = vrot.lane.b32.xlu0 %v43_v13, %s215_s16  ;;  %v46_v14 = vld [vmem:[#allocation2 + $0x18] sm:$0xff]  ;;  %v44_v15 = vld [vmem:[#allocation2 + $0x8] sm:$0xff]  ;;  %v47_v17 = vld [vmem:[#allocation2 + $0x20] sm:$0xff]  ;;  %s216_s2 = smov [#allocation4]  }
  0x21   :  { %v48_v16 = vld [vmem:[#allocation2 + $0x28] sm:$0xff]  ;;  %v50_v18 = vld [vmem:[#allocation2 + $0x38] sm:$0xff]  ;;  %v49_v19 = vld [vmem:[#allocation2 + $0x30] sm:$0xff]  ;;  %s121_s4 = sshll.u32 %s216_s2, 4  ;;  %s122_s4 = int_to_ptr.vmem [resolvable:$true] %s121_s4 }
  0x22   :  { %v52_v20 = vld [vmem:[#allocation2 + $0x48] sm:$0xff]  ;;  %v51_v21 = vld [vmem:[#allocation2 + $0x40] sm:$0xff]  ;;  %v54_v22 = vld [vmem:[#allocation2 + $0x58] sm:$0xff]  ;;  %s183_s5 = scalar_lea.vmem %s122_s4, 1536  ;;  %p188_p13 = scmp.lt.s32.totalorder %s122_s4, %s122_s4 }
  0x23   :  { %v53_v23 = vld [vmem:[#allocation2 + $0x50] sm:$0xff]  ;;  %p184_p12 = scmp.ne.s32.totalorder %s122_s4, %s183_s5  ;;  %p189_p0 = scmp.lt.s32.totalorder %s183_s5, %s183_s5 }
  0x24   :  { %73 = vrot.lane.b32.xlu1 %v46_v14, %s215_s16  ;;  %69 = vrot.lane.b32.xlu0 %v44_v15, %s215_s16 }
  0x25   :  { %p190_p1 = por %p189_p0, %p188_p13 }
  0x27   :  { %p191_p2 = pnand %p190_p1, %p184_p12 }
  0x28   :  { %77 = vrot.lane.b32.xlu1 %v48_v16, %s215_s16  ;;  %75 = vrot.lane.b32.xlu0 %v47_v17, %s215_s16 }
  0x2c   :  { %81 = vrot.lane.b32.xlu1 %v50_v18, %s215_s16  ;;  %79 = vrot.lane.b32.xlu0 %v49_v19, %s215_s16 }
  0x30   :  { %85 = vrot.lane.b32.xlu1 %v52_v20, %s215_s16  ;;  %83 = vrot.lane.b32.xlu0 %v51_v21, %s215_s16 }
  0x34   :  { %89 = vrot.lane.b32.xlu1 %v54_v22, %s215_s16  ;;  %87 = vrot.lane.b32.xlu0 %v53_v23, %s215_s16 }
  0x92   :  { %v72_v24 = vpop.permute.xlu1 %71  ;;  %v68_v25 = vpop.permute.xlu0 %67 }
  0x93   :  { %106 = vst.msk [vmem:[#allocation4 + $0x10] sm:$0xff] %vm103_vm4, %v72_v24  ;;  %104 = vst.msk [vmem:[#allocation4] sm:$0xff] %vm103_vm4, %v68_v25 }
  0x96   :  { %v74_v26 = vpop.permute.xlu1 %73  ;;  %v70_v27 = vpop.permute.xlu0 %69 }
  0x97   :  { %107 = vst.msk [vmem:[#allocation4 + $0x18] sm:$0xff] %vm103_vm4, %v74_v26  ;;  %105 = vst.msk [vmem:[#allocation4 + $0x8] sm:$0xff] %vm103_vm4, %v70_v27 }
  0x9a   :  { %v78_v28 = vpop.permute.xlu1 %77  ;;  %v76_v29 = vpop.permute.xlu0 %75 }
  0x9b   :  { %109 = vst.msk [vmem:[#allocation4 + $0x28] sm:$0xff] %vm103_vm4, %v78_v28  ;;  %108 = vst.msk [vmem:[#allocation4 + $0x20] sm:$0xff] %vm103_vm4, %v76_v29 }
  0x9e   :  { %v82_v30 = vpop.permute.xlu1 %81  ;;  %v80_v31 = vpop.permute.xlu0 %79 }
  0x9f   :  { %111 = vst.msk [vmem:[#allocation4 + $0x38] sm:$0xff] %vm103_vm4, %v82_v30  ;;  %110 = vst.msk [vmem:[#allocation4 + $0x30] sm:$0xff] %vm103_vm4, %v80_v31 }
  0xa2   :  { %v86_v32 = vpop.permute.xlu1 %85  ;;  %v84_v33 = vpop.permute.xlu0 %83 }
  0xa3   :  { %113 = vst.msk [vmem:[#allocation4 + $0x48] sm:$0xff] %vm103_vm4, %v86_v32  ;;  %112 = vst.msk [vmem:[#allocation4 + $0x40] sm:$0xff] %vm103_vm4, %v84_v33 }
  0xa6   :  { %v90_v34 = vpop.permute.xlu1 %89  ;;  %v88_v35 = vpop.permute.xlu0 %87 }
  0xa7   :  { %115 = vst.msk [vmem:[#allocation4 + $0x58] sm:$0xff] %vm103_vm4, %v90_v34  ;;  %114 = vst.msk [vmem:[#allocation4 + $0x50] sm:$0xff] %vm103_vm4, %v88_v35 }
  0xa8   :  { %194 = shalt.err (!%p191_p2)
}
  0xa9   :  { %s195_s19 = scalar_lea.hbm %s306_s3, 1536 }
  0xaa   :  { %p196_p3 = scmp.ne.s32.totalorder %s306_s3, %s195_s19  ;;  %p199_p4 = scmp.lt.u32.totalorder %s195_s19, %s306_s3 }
  0xac   :  { %p201_p5 = pnand %p199_p4, %p196_p3 }
  0xae   :  { %204 = shalt.err (!%p201_p5)
}
  0xaf   :  { %s217_s24 = smov 128   ;;  %s218_s25 = smov 8  }
  0xb0   :  { %127 = dma.vmem_to_hbm [thread:$0]  %s122_s4, 1536, %s306_s3, [#allocation5], %s217_s24, %s217_s24, %s218_s25  }
  0xb1   :  { %207 = dma.done.wait [#allocation5], 1536  }
  0xb2   :  { %208 = vsyncadd [#allocation5], 4294965760 }
  0xb3   :  { %139 = vsyncpa [#allocation5], 1 }
  0xb4   :  { %140 = vsyncmov [#allocation3] }
  0xb7   :  { %s141_s28 = vpop.sfrf %140 }
  0xb8   :  { %p147_p6 = scmp.ne.s32.totalorder %s141_s28, 0 }
  0xba   :  { %145 = shalt.err (%p147_p6)  }

</bundles_post_ra>
